<compile_context>
chip_gen: v7x
topology: tpu7x:2x2x1
jax: 0.10.0
libtpu: 0.0.40
codegen_flags: <defaults>
</compile_context>

<pallas_src>
import jax
import jax.numpy as jnp
from jax.experimental import pallas as pl
from jax.experimental.pallas import tpu as pltpu


def _pos_enc_kernel(x_ref, pe_ref, o_ref):
    # x_ref:  (tr, tc) tile of the flattened (B, N*E) input
    # pe_ref: (1,  tc) tile of the flattened positional encoding (broadcast)
    # o_ref:  (tr, tc)
    o_ref[...] = x_ref[...] + pe_ref[...]


def _round_up(v, m):
    return ((v + m - 1) // m) * m


def _choose_tiles(B, F, itemsize, target_block_bytes):
    """Pick (row_tile, col_tile) for the flattened (B, F) problem.

    Blocks are kept (8, 128)-legal (or full-extent) and tr*tc*itemsize stays
    at or below target_block_bytes whenever such a legal block exists, so the
    vmem_limit derived from the block size is never exceeded.
    """
    # Whole problem fits in a single block.
    if B * F * itemsize <= target_block_bytes:
        return B, F

    # Whole rows fit: tile over rows at full column width.
    if F * itemsize <= target_block_bytes:
        tc = F
        rows_budget = target_block_bytes // (F * itemsize)  # >= 1
        if B <= rows_budget:
            return B, tc
        if rows_budget >= 8:
            return (rows_budget // 8) * 8, tc
        # Fewer than 8 rows fit at full width: use the minimal legal row tile
        # and shrink the column tile so the block stays within budget
        # (fixes the old up-to-8x budget overshoot).
        tr = min(B, 8)
        tc = min(F, max(128, (target_block_bytes // (tr * itemsize) // 128) * 128))
        return tr, tc

    # Rows are wider than the budget: minimal legal row tile, lane-dense
    # column tile sized to the budget.
    tr = min(B, 8)
    tc = min(F, max(128, (target_block_bytes // (tr * itemsize) // 128) * 128))
    return tr, tc


def _maybe_split_for_two_cores(B, F, tr, tc):
    """If the whole problem fits one block, split it so chips with two
    TensorCores (v7x) keep both cores busy.  No-op for multi-step grids and
    for problems too small to split legally."""
    if pl.cdiv(B, tr) * pl.cdiv(F, tc) >= 2:
        return tr, tc
    if B >= 16:                       # split rows with multiple-of-8 tiles
        return _round_up(pl.cdiv(B, 2), 8), tc
    if F >= 256:                      # split cols with multiple-of-128 tiles
        return tr, _round_up(pl.cdiv(F, 2), 128)
    return tr, tc                     # tiny problem; one step is fine


def positional_encoding_forward(x, pe, *, target_block_bytes=4 << 20):
    """x: (B, N, E), pe: (1, N, E) -> (B, N, E) = x + pe (broadcast over B)."""
    B, N, E = x.shape
    assert pe.shape == (1, N, E)

    # Single native-dtype VPU add per vreg.  Store the parameter in x.dtype at
    # init time to make this cast a no-op per call.
    if pe.dtype != x.dtype:
        pe = pe.astype(x.dtype)

    F = N * E
    itemsize = jnp.dtype(x.dtype).itemsize
    x2 = x.reshape(B, F)
    pe2 = pe.reshape(1, F)

    tr, tc = _choose_tiles(B, F, itemsize, target_block_bytes)
    tr, tc = _maybe_split_for_two_cores(B, F, tr, tc)
    n_row = pl.cdiv(B, tr)
    n_col = pl.cdiv(F, tc)

    # Double-buffered x and out blocks, pe blocks, plus headroom.  Cap at
    # 48 MiB so v7x (64 MiB VMEM/TC) keeps compiler-internal headroom.
    block_bytes = tr * tc * itemsize
    pe_block_bytes = tc * itemsize
    vmem_limit_bytes = int(
        min(48 << 20,
            max(16 << 20, 4 * block_bytes + 2 * pe_block_bytes + (2 << 20)))
    )

    cost = pl.CostEstimate(
        flops=B * F,
        transcendentals=0,
        bytes_accessed=2 * B * F * itemsize + F * itemsize,
    )

    out2 = pl.pallas_call(
        _pos_enc_kernel,
        out_shape=jax.ShapeDtypeStruct((B, F), x.dtype),
        grid_spec=pltpu.PrefetchScalarGridSpec(
            num_scalar_prefetch=0,
            # Column axis outer, batch/row axis inner: pe's block index is
            # constant along the innermost axis -> its DMA is elided after the
            # first fetch of each column tile.
            grid=(n_col, n_row),
            in_specs=[
                pl.BlockSpec((tr, tc), lambda c, r: (r, c)),
                pl.BlockSpec((1, tc), lambda c, r: (0, c)),
            ],
            out_specs=pl.BlockSpec((tr, tc), lambda c, r: (r, c)),
        ),
        compiler_params=pltpu.CompilerParams(
            dimension_semantics=("parallel", "parallel"),
            vmem_limit_bytes=vmem_limit_bytes,
        ),
        cost_estimate=cost,
        # x -> out aliasing: removes the separate output allocation when x is
        # donated/dead after this op; XLA copies otherwise, so semantics are
        # unchanged.
        input_output_aliases={0: 0},
    )(x2, pe2)

    return out2.reshape(B, N, E)


if __name__ == "__main__":
    fwd = jax.jit(positional_encoding_forward,
                  static_argnames=("target_block_bytes",))

    # --- small test consistent with the module: batch=2, n_positions=8, embed=32
    B, N, E = 2, 8, 32
    key = jax.random.PRNGKey(0)
    kx, kpe = jax.random.split(key)

    x = jax.random.normal(kx, (B, N, E), dtype=jnp.float32)
    # nn.Parameter(torch.zeros(...)) would be all-zeros; use random values so
    # the addition is actually exercised.
    pe = jax.random.normal(kpe, (1, N, E), dtype=jnp.float32)

    ref = x + pe                      # computed before the (aliased) kernel call
    out = jax.block_until_ready(fwd(x, pe))
    assert out.shape == (B, N, E)
    assert out.dtype == x.dtype
    assert jnp.allclose(out, ref, atol=1e-6), "mismatch vs reference (f32)"

    # --- exercise the multi-step tiling path (lane-dense 2-D grid) with bf16
    # inputs, an f32 pe (cast inside), and a deliberately tiny block budget.
    B2, N2, E2 = 16, 32, 128
    x_b = jax.random.normal(kx, (B2, N2, E2), dtype=jnp.bfloat16)
    pe_b = jax.random.normal(kpe, (1, N2, E2), dtype=jnp.float32)
    ref_b = x_b + pe_b.astype(jnp.bfloat16)
    out_b = jax.block_until_ready(fwd(x_b, pe_b, target_block_bytes=2048))
    assert out_b.shape == (B2, N2, E2)
    assert out_b.dtype == jnp.bfloat16
    assert jnp.allclose(out_b.astype(jnp.float32), ref_b.astype(jnp.float32)), \
        "mismatch vs reference (bf16, tiled)"

    print("KERNEL_OK")
</pallas_src>

<mosaic_0001>
module attributes {stable_mosaic.version = 11 : i64} {
  func.func @_pos_enc_kernel(%arg0: i32, %arg1: i32, %arg2: memref<2x128xf32, #tpu.memory_space<vmem>>, %arg3: memref<1x128xf32, #tpu.memory_space<vmem>>, %arg4: memref<2x128xf32, #tpu.memory_space<vmem>>) attributes {dimension_semantics = [#tpu.dimension_semantics<parallel>, #tpu.dimension_semantics<parallel>], iteration_bounds = array<i64: 2, 1>, scalar_prefetch = 0 : i64, scratch_operands = 0 : i64, tpu.core_type = #tpu.core_type<tc>, window_params = [{transform_indices = @transform_0, window_bounds = array<i64: 2, 128>}, {transform_indices = @transform_1, window_bounds = array<i64: 1, 128>}, {transform_indices = @transform_2, window_bounds = array<i64: 2, 128>}]} {
    %c0 = arith.constant 0 : index
    %c0_0 = arith.constant 0 : index
    %0 = vector.load %arg2[%c0, %c0_0] : memref<2x128xf32, #tpu.memory_space<vmem>>, vector<2x128xf32>
    %c0_1 = arith.constant 0 : index
    %c0_2 = arith.constant 0 : index
    %1 = vector.load %arg3[%c0_1, %c0_2] : memref<1x128xf32, #tpu.memory_space<vmem>>, vector<1x128xf32>
    %2 = vector.broadcast %1 : vector<1x128xf32> to vector<2x128xf32>
    %3 = arith.addf %0, %2 : vector<2x128xf32>
    %c0_3 = arith.constant 0 : index
    %c0_4 = arith.constant 0 : index
    %4 = vector.load %arg4[%c0_3, %c0_4] : memref<2x128xf32, #tpu.memory_space<vmem>>, vector<2x128xf32>
    tpu.vector_store %arg4[%c0_3, %c0_4], %3 {strides = array<i32>} : memref<2x128xf32, #tpu.memory_space<vmem>>, vector<2x128xf32>,
    return
  }
  func.func @transform_0(%arg0: i32, %arg1: i32) -> (i32, i32) {
    %c0_i32 = arith.constant 0 : i32
    return %arg1, %arg0 : i32, i32
  }
  func.func @transform_1(%arg0: i32, %arg1: i32) -> (i32, i32) {
    %c0_i32 = arith.constant 0 : i32
    %c0_i32_0 = arith.constant 0 : i32
    return %c0_i32, %arg0 : i32, i32
  }
  func.func @transform_2(%arg0: i32, %arg1: i32) -> (i32, i32) {
    %c0_i32 = arith.constant 0 : i32
    return %arg1, %arg0 : i32, i32
  }
}

</mosaic_0001>

<bundles_post_ra>
// kernel: positional_encoding_forward.1
= control target key start
LH: loop header
LB: loop body
LE: loop exit
PB: predicated region body
PF: predicated region fallthrough
CT: control target
= control target key end

     0   :  { %s364_s9 = smov 0   ;;  %s366_s10 = smov 0   ;;  %s383_s0 = inlined_call_operand.vmem [shape: f32[2,256], index: 0, kind: input, shape index: {}, may-alias: {0,2}]   ;;  %s384_s1 = inlined_call_operand.vmem [shape: f32[1,256], index: 1, kind: input, shape index: {}]   ;;  %s385_s2 = inlined_call_operand.vmem [shape: f32[2,256], index: 2, kind: output, shape index: {}, may-alias: {0,2}]  }
   0x1   :  { %s345_s11 = smov 0  }
   0x2 LB: > { %s24_s12 = sadd.s32 1, %s343_s10  ;;  %p295_p0 = scmp.ge.s32.totalorder %s347_s11, 1  ;;  %s347_s11 = sphi %s345_s11, %s12_s11   ;;  %s343_s10 = sphi %s366_s10, %s387_s10   ;;  %s339_s9 = sphi %s364_s9, %s386_s9  }
   0x3   : > { %p26_p1 = scmp.ge.s32.totalorder %s24_s12, 2  ;;  %p139_p2 = scmp.lt.s32.totalorder %s347_s11, 3 }
   0x5   : > { %s389_s12 = smov (%p26_p1, %s24_s12), 0  ;;  %p140_p3 = pnand %p295_p0, %p139_p2 }
   0x6   : > { %p172_p4 = scmp.lt.s32.totalorder (!%p140_p3), %s339_s9, 1 }
   0x7   : > { %143 = sbr.rel (%p140_p3) target bundleno = 21 (0x15), region = 28 }
   0xe   : > { %s391_s9 = smov (!%p172_p4, %s339_s9), 1 }
   0xf   : > { %s296_s13 = sshll.u32 %s391_s9, 1  ;;  %s180_s16 = scalar_lea.vmem %s384_s1, %s391_s9 }
  0x10   : > { %s177_s19 = scalar_lea.vmem %s383_s0, %s296_s13  ;;  %v298_v0 = vld [vmem:[%s180_s16] ss:$0 sm:$0xff]  ;;  %s188_s22 = scalar_lea.vmem %s385_s2, %s296_s13 }
  0x11   : > { %v189_v1 = vld [vmem:[%s177_s19] sm:$0x3] }
  0x12   : > { %v197_v2 = vadd.f32 %v298_v0, %v189_v1 }
  0x14   : > { %198 = vst [vmem:[%s188_s22] sm:$0x3] %v197_v2 }
  0x15 PF: > { %s12_s11 = sadd.s32 1, %s347_s11   ;;  %s386_s9 = smov %s343_s10 }
  0x16   : > { %p9_p5 = scmp.ge.s32.totalorder %s12_s11, 4   ;;  %s387_s10 = smov %s389_s12 }
  0x18   :  { %11 = sbr.rel (!%p9_p5) target bundleno = 2 (0x2), region = 61 }

</bundles_post_ra>
